<compile_context>
chip_gen: v6e
topology: v6e:2x2x1
jax: 0.10.0
libtpu: 0.0.40
codegen_flags: <defaults>
</compile_context>

<pallas_src>
import functools

import jax
import jax.numpy as jnp
from jax.experimental import pallas as pl
from jax.experimental.pallas import tpu as pltpu

BN_EPS = 1e-5
LANES = 128
_SUBLANE_PACK = 16  # bf16 packs 16 rows per (16,128) vreg tile -> align slab offsets


def _round_up(x, m):
    return ((x + m - 1) // m) * m


def _slab_offsets(features, hidden):
    """Row offsets of each weight inside the packed [rows, 128] bf16 weight slab."""
    order = [
        ("w1_root", features), ("w1_rel", features),
        ("w2_root", hidden), ("w2_rel", hidden),
        ("w3_root", hidden), ("w3_rel", hidden),
        ("lin_max", hidden), ("lin_mean", hidden),
    ]
    offs, cur = {}, 0
    for name, nrows in order:
        offs[name] = cur
        cur += _round_up(nrows, _SUBLANE_PACK)
    return offs, _round_up(cur, _SUBLANE_PACK)


# ---------------------------------------------------------------------------
# Kernel: G graphs per grid step. adj/x blocks are per-step; weight/bias slabs
# are VMEM-resident (constant index_map) across the whole grid.
# ---------------------------------------------------------------------------
def _graph_gnn_kernel(adj_ref, x_ref, w_ref, b_ref, out_ref, *,
                      graphs, nodes, features, hidden):
    G, N, F, H = graphs, nodes, features, hidden
    GN = G * N
    offs, _ = _slab_offsets(F, H)

    # f32 in HBM/VMEM; cast to bf16 in VMEM for MXU operands.
    adj = adj_ref[...].astype(jnp.bfloat16)                 # [G, N, N], adj[g, dst, src]
    x = x_ref[...].astype(jnp.bfloat16).reshape(GN, F)      # [G*N, F]

    def wslice(name, nrows, ncols):
        o = offs[name]
        return w_ref[o:o + nrows, 0:ncols]

    w1_root = wslice("w1_root", F, H)        # [F, H] bf16 (BN scale folded)
    w1_rel = wslice("w1_rel", F, H)
    w2_root = wslice("w2_root", H, H)
    w2_rel = wslice("w2_rel", H, H)
    w3_root = wslice("w3_root", H, H)
    w3_rel = wslice("w3_rel", H, H)
    w_lin_max = wslice("lin_max", H, LANES)  # [H, 128] (only `labels` cols non-zero)
    w_lin_mean = wslice("lin_mean", H, LANES)

    b1 = b_ref[0:1, 0:H]                     # [1, H] f32 (BN shift folded)
    b2 = b_ref[1:2, 0:H]
    b3 = b_ref[2:3, 0:H]
    b_lin = b_ref[3:4, :]                    # [1, 128]

    def conv_relu(h_flat, w_root, w_rel, bias):
        # h_flat: [G*N, Din] bf16. Reassociated GraphConv:
        #   root = h @ W_root           (one MXU pass over all G graphs)
        #   m    = adj @ h              (per-graph message aggregation, batched einsum)
        #   rel  = m @ W_rel
        # root-dot and adj-dot both depend only on h -> issue concurrently; no
        # unaligned lane slices anywhere.
        root = jnp.dot(h_flat, w_root, preferred_element_type=jnp.float32)   # [GN, H] f32
        m = jnp.einsum("gij,gjf->gif", adj, h_flat.reshape(G, N, -1),
                       preferred_element_type=jnp.float32)                   # [G, N, Din] f32
        rel = jnp.dot(m.reshape(GN, -1).astype(jnp.bfloat16), w_rel,
                      preferred_element_type=jnp.float32)                    # [GN, H] f32
        # BN already folded; Dropout(p=0.0) == identity.
        return jnp.maximum(root + rel + bias, 0.0)                           # f32

    emb1 = conv_relu(x, w1_root, w1_rel, b1)                                 # [GN, H]
    emb2 = conv_relu(emb1.astype(jnp.bfloat16), w2_root, w2_rel, b2)
    emb3 = conv_relu(emb2.astype(jnp.bfloat16), w3_root, w3_rel, b3)

    # global pooling over all nodes of each graph (batch=None -> one graph per sample).
    # TODO(synk): if graphs were padded to a common N with dummy nodes, a per-graph
    # node mask would be needed here (max over ReLU(bias) rows / mean divides by N).
    emb3_g = emb3.reshape(G, N, H)
    max_p = jnp.max(emb3_g, axis=1)                                          # [G, H] f32
    mean_p = jnp.mean(emb3_g, axis=1)                                        # [G, H] f32

    # lin(concat([maxP, meanP], -1)) as two lane-0-aligned dots against the split,
    # 128-lane-padded final weight (avoids a lane-offset concat).
    out = (jnp.dot(max_p.astype(jnp.bfloat16), w_lin_max,
                   preferred_element_type=jnp.float32)
           + jnp.dot(mean_p.astype(jnp.bfloat16), w_lin_mean,
                     preferred_element_type=jnp.float32)
           + b_lin)                                                          # [G, 128]
    out_ref[...] = out.astype(out_ref.dtype)


# ---------------------------------------------------------------------------
# Wrapper
# ---------------------------------------------------------------------------
def graph_gnn_forward(adj, x, w_slab, b_slab, *, features=10, hidden=20, labels=2,
                      graphs_per_step=None):
    """adj: [B, N, N] f32 (adj[b, dst, src]); x: [B, N, F] f32. Returns [B, labels] f32."""
    B, N, _ = adj.shape
    if graphs_per_step is None:
        # Keep >=2 grid steps when B > 1 so v7x's 2 TensorCores both get work, while
        # amortizing per-step overhead. On single-TC v5e/v6e, pass graphs_per_step=B
        # to collapse the batch into one step (128+ MXU rows per pass at N=16).
        graphs_per_step = max(1, (B + 1) // 2)
    G = min(graphs_per_step, B)
    num_steps = pl.cdiv(B, G)
    B_pad = num_steps * G
    if B_pad != B:
        adj = jnp.pad(adj, ((0, B_pad - B), (0, 0), (0, 0)))
        x = jnp.pad(x, ((0, B_pad - B), (0, 0), (0, 0)))

    kernel = functools.partial(_graph_gnn_kernel, graphs=G, nodes=N,
                               features=features, hidden=hidden)
    out = pl.pallas_call(
        kernel,
        out_shape=jax.ShapeDtypeStruct((num_steps, G, LANES), jnp.float32),
        grid=(num_steps,),
        in_specs=[
            pl.BlockSpec((G, N, N), lambda s: (s, 0, 0)),          # G graphs' adj per step
            pl.BlockSpec((G, N, features), lambda s: (s, 0, 0)),   # G graphs' features
            pl.BlockSpec(w_slab.shape, lambda s: (0, 0)),          # resident bf16 weights
            pl.BlockSpec(b_slab.shape, lambda s: (0, 0)),          # resident f32 biases
        ],
        out_specs=pl.BlockSpec((None, G, LANES), lambda s: (s, 0, 0)),  # dense [G,128] store
        compiler_params=pltpu.CompilerParams(
            dimension_semantics=("parallel",),   # steps are independent (megacore / v7x 2 TCs)
        ),
    )(adj, x, w_slab, b_slab)
    return out.reshape(B_pad, LANES)[:B, :labels]


# ---------------------------------------------------------------------------
# Parameter construction (PyTorch-equivalent) + folding / packing into slabs
# ---------------------------------------------------------------------------
def xavier_uniform(key, fan_in, fan_out):
    bound = (6.0 / (fan_in + fan_out)) ** 0.5
    # stored as [in, out] so the kernel computes x @ W (same math as torch's x @ W.T)
    return jax.random.uniform(key, (fan_in, fan_out), jnp.float32, -bound, bound)


def init_params(key, features=10, hidden=20, labels=2):
    ks = jax.random.split(key, 10)

    def linear_bias_default(k, fan_in, n):
        # matches torch.nn.Linear default bias init: U(-1/sqrt(fan_in), 1/sqrt(fan_in))
        bound = 1.0 / (fan_in ** 0.5)
        return jax.random.uniform(k, (n,), jnp.float32, -bound, bound)

    return {
        "w1_rel": xavier_uniform(ks[0], features, hidden),
        "w1_root": xavier_uniform(ks[1], features, hidden),
        "b1_rel": linear_bias_default(ks[2], features, hidden),
        "w2_rel": xavier_uniform(ks[3], hidden, hidden),
        "w2_root": xavier_uniform(ks[4], hidden, hidden),
        "b2_rel": linear_bias_default(ks[5], hidden, hidden),
        "w3_rel": xavier_uniform(ks[6], hidden, hidden),
        "w3_root": xavier_uniform(ks[7], hidden, hidden),
        "b3_rel": linear_bias_default(ks[8], hidden, hidden),
        # BatchNorm eval-mode defaults (running_mean=0, running_var=1, gamma=1, beta=0)
        "bn1_gamma": jnp.ones((hidden,), jnp.float32),
        "bn1_beta": jnp.zeros((hidden,), jnp.float32),
        "bn1_mean": jnp.zeros((hidden,), jnp.float32),
        "bn1_var": jnp.ones((hidden,), jnp.float32),
        "bn2_gamma": jnp.ones((hidden,), jnp.float32),
        "bn2_beta": jnp.zeros((hidden,), jnp.float32),
        "bn2_mean": jnp.zeros((hidden,), jnp.float32),
        "bn2_var": jnp.ones((hidden,), jnp.float32),
        "lin_w": xavier_uniform(ks[9], 2 * hidden, labels),
        "lin_b": jnp.zeros((labels,), jnp.float32),
    }


def pack_params(params, features=10, hidden=20, labels=2):
    """Fold eval-mode BN + biases into per-layer weights and pack into two slabs."""
    H = hidden
    offs, rows = _slab_offsets(features, hidden)

    def bn_scale_shift(gamma, beta, mean, var):
        # BN(y) = y*s + t with s = gamma*rsqrt(var+eps), t = beta - mean*s  (per feature)
        s = gamma * jax.lax.rsqrt(var + BN_EPS)
        return s, beta - mean * s

    s1, t1 = bn_scale_shift(params["bn1_gamma"], params["bn1_beta"],
                            params["bn1_mean"], params["bn1_var"])
    s2, t2 = bn_scale_shift(params["bn2_gamma"], params["bn2_beta"],
                            params["bn2_mean"], params["bn2_var"])

    w1_root, w1_rel = params["w1_root"] * s1, params["w1_rel"] * s1
    b1 = params["b1_rel"] * s1 + t1
    w2_root, w2_rel = params["w2_root"] * s2, params["w2_rel"] * s2
    b2 = params["b2_rel"] * s2 + t2
    w3_root, w3_rel = params["w3_root"], params["w3_rel"]     # layer 3 has no BN
    b3 = params["b3_rel"]
    lin_max, lin_mean = params["lin_w"][:H], params["lin_w"][H:]   # concat order: [maxP, meanP]

    w_slab = jnp.zeros((rows, LANES), jnp.float32)
    w_slab = w_slab.at[offs["w1_root"]:offs["w1_root"] + features, 0:H].set(w1_root)
    w_slab = w_slab.at[offs["w1_rel"]:offs["w1_rel"] + features, 0:H].set(w1_rel)
    w_slab = w_slab.at[offs["w2_root"]:offs["w2_root"] + H, 0:H].set(w2_root)
    w_slab = w_slab.at[offs["w2_rel"]:offs["w2_rel"] + H, 0:H].set(w2_rel)
    w_slab = w_slab.at[offs["w3_root"]:offs["w3_root"] + H, 0:H].set(w3_root)
    w_slab = w_slab.at[offs["w3_rel"]:offs["w3_rel"] + H, 0:H].set(w3_rel)
    w_slab = w_slab.at[offs["lin_max"]:offs["lin_max"] + H, 0:labels].set(lin_max)
    w_slab = w_slab.at[offs["lin_mean"]:offs["lin_mean"] + H, 0:labels].set(lin_mean)
    w_slab = w_slab.astype(jnp.bfloat16)          # MXU operands in bf16

    b_slab = jnp.zeros((8, LANES), jnp.float32)   # biases stay f32 (VPU adds in f32)
    b_slab = b_slab.at[0, 0:H].set(b1)
    b_slab = b_slab.at[1, 0:H].set(b2)
    b_slab = b_slab.at[2, 0:H].set(b3)
    b_slab = b_slab.at[3, 0:labels].set(params["lin_b"])
    return w_slab, b_slab


def build_dense_adjacency(edge_index, edge_weights, num_nodes):
    # plain-JAX glue: adj[dst, src] = sum of edge weights on (src -> dst) edges
    src, dst = edge_index[0], edge_index[1]
    adj = jnp.zeros((num_nodes, num_nodes), jnp.float32)
    return adj.at[dst, src].add(edge_weights)


if __name__ == "__main__":
    key = jax.random.PRNGKey(0)
    k_x, k_w, k_p = jax.random.split(key, 3)

    B, N = 8, 16
    features, hidden, labels = 10, 20, 2

    # per-graph node features
    x = jax.random.normal(k_x, (B, N, features), jnp.float32)

    # deterministic small graph topology: a ring plus its reverse edges,
    # with per-graph random edge weights (as the PGExplainer mask would produce)
    fwd = jnp.arange(N)
    src = jnp.concatenate([fwd, (fwd + 1) % N])
    dst = jnp.concatenate([(fwd + 1) % N, fwd])
    edge_index = jnp.stack([src, dst]).astype(jnp.int32)            # [2, E]
    edge_weights = jax.random.uniform(k_w, (B, edge_index.shape[1]), jnp.float32)

    build = functools.partial(build_dense_adjacency, edge_index, num_nodes=N)
    adj = jax.vmap(build)(edge_weights)                             # [B, N, N] f32

    params = init_params(k_p, features=features, hidden=hidden, labels=labels)
    w_slab, b_slab = pack_params(params, features=features, hidden=hidden, labels=labels)

    out = graph_gnn_forward(adj, x, w_slab, b_slab,
                            features=features, hidden=hidden, labels=labels)
    out = jax.block_until_ready(out)
    assert out.shape == (B, labels)
    print("KERNEL_OK")
</pallas_src>

<mosaic_0001>
module attributes {stable_mosaic.version = 11 : i64} {
  func.func @_graph_gnn_kernel(%arg0: i32, %arg1: memref<4x16x16xf32, #tpu.memory_space<vmem>>, %arg2: memref<4x16x10xf32, #tpu.memory_space<vmem>>, %arg3: memref<224x128xbf16, #tpu.memory_space<vmem>>, %arg4: memref<8x128xf32, #tpu.memory_space<vmem>>, %arg5: memref<1x4x128xf32, #tpu.memory_space<vmem>>) attributes {dimension_semantics = [#tpu.dimension_semantics<parallel>], iteration_bounds = array<i64: 2>, scalar_prefetch = 0 : i64, scratch_operands = 0 : i64, tpu.core_type = #tpu.core_type<tc>, window_params = [{transform_indices = @transform_0, window_bounds = array<i64: 4, 16, 16>}, {transform_indices = @transform_1, window_bounds = array<i64: 4, 16, 10>}, {pipeline_mode = #tpu.pipeline_mode<synchronous>, transform_indices = @transform_2, window_bounds = array<i64: 224, 128>}, {pipeline_mode = #tpu.pipeline_mode<synchronous>, transform_indices = @transform_3, window_bounds = array<i64: 8, 128>}, {transform_indices = @transform_4, window_bounds = array<i64: 1, 4, 128>}]} {
    %c0 = arith.constant 0 : index
    %c0_0 = arith.constant 0 : index
    %c0_1 = arith.constant 0 : index
    %0 = vector.load %arg1[%c0, %c0_0, %c0_1] : memref<4x16x16xf32, #tpu.memory_space<vmem>>, vector<4x16x16xf32>
    %1 = arith.truncf %0 : vector<4x16x16xf32> to vector<4x16x16xbf16>
    %c0_2 = arith.constant 0 : index
    %c0_3 = arith.constant 0 : index
    %c0_4 = arith.constant 0 : index
    %2 = vector.load %arg2[%c0_2, %c0_3, %c0_4] : memref<4x16x10xf32, #tpu.memory_space<vmem>>, vector<4x16x10xf32>
    %3 = arith.truncf %2 : vector<4x16x10xf32> to vector<4x16x10xbf16>
    %4 = vector.shape_cast %3 : vector<4x16x10xbf16> to vector<64x10xbf16>
    %c0_5 = arith.constant 0 : index
    %c0_6 = arith.constant 0 : index
    %5 = vector.load %arg3[%c0_5, %c0_6] : memref<224x128xbf16, #tpu.memory_space<vmem>>, vector<10x20xbf16>
    %c16 = arith.constant 16 : index
    %c0_7 = arith.constant 0 : index
    %6 = vector.load %arg3[%c16, %c0_7] : memref<224x128xbf16, #tpu.memory_space<vmem>>, vector<10x20xbf16>
    %c32 = arith.constant 32 : index
    %c0_8 = arith.constant 0 : index
    %7 = vector.load %arg3[%c32, %c0_8] : memref<224x128xbf16, #tpu.memory_space<vmem>>, vector<20x20xbf16>
    %c64 = arith.constant 64 : index
    %c0_9 = arith.constant 0 : index
    %8 = vector.load %arg3[%c64, %c0_9] : memref<224x128xbf16, #tpu.memory_space<vmem>>, vector<20x20xbf16>
    %c96 = arith.constant 96 : index
    %c0_10 = arith.constant 0 : index
    %9 = vector.load %arg3[%c96, %c0_10] : memref<224x128xbf16, #tpu.memory_space<vmem>>, vector<20x20xbf16>
    %c128 = arith.constant 128 : index
    %c0_11 = arith.constant 0 : index
    %10 = vector.load %arg3[%c128, %c0_11] : memref<224x128xbf16, #tpu.memory_space<vmem>>, vector<20x20xbf16>
    %c160 = arith.constant 160 : index
    %c0_12 = arith.constant 0 : index
    %11 = vector.load %arg3[%c160, %c0_12] : memref<224x128xbf16, #tpu.memory_space<vmem>>, vector<20x128xbf16>
    %c192 = arith.constant 192 : index
    %c0_13 = arith.constant 0 : index
    %12 = vector.load %arg3[%c192, %c0_13] : memref<224x128xbf16, #tpu.memory_space<vmem>>, vector<20x128xbf16>
    %c0_14 = arith.constant 0 : index
    %c0_15 = arith.constant 0 : index
    %13 = vector.load %arg4[%c0_14, %c0_15] : memref<8x128xf32, #tpu.memory_space<vmem>>, vector<1x20xf32>
    %c1 = arith.constant 1 : index
    %c0_16 = arith.constant 0 : index
    %14 = vector.load %arg4[%c1, %c0_16] : memref<8x128xf32, #tpu.memory_space<vmem>>, vector<1x20xf32>
    %c2 = arith.constant 2 : index
    %c0_17 = arith.constant 0 : index
    %15 = vector.load %arg4[%c2, %c0_17] : memref<8x128xf32, #tpu.memory_space<vmem>>, vector<1x20xf32>
    %c3 = arith.constant 3 : index
    %c0_18 = arith.constant 0 : index
    %16 = vector.load %arg4[%c3, %c0_18] : memref<8x128xf32, #tpu.memory_space<vmem>>, vector<1x128xf32>
    %cst = arith.constant dense<0.000000e+00> : vector<64x20xf32>
    %17 = tpu.matmul %4, %5, %cst {dimension_numbers = #tpu.dot_dimension_numbers<[1], [0], [0], [1], [0, 0, 1, 1], [], []>} : vector<64x10xbf16>, vector<10x20xbf16>, vector<64x20xf32> -> vector<64x20xf32>
    %18 = vector.shape_cast %4 : vector<64x10xbf16> to vector<4x16x10xbf16>
    "tpu.trace_start"() <{level = 10 : i32, message = "gij,gjf->gif"}> : () -> ()
    %cst_19 = arith.constant dense<0.000000e+00> : vector<4x16x10xf32>
    %19 = tpu.matmul %1, %18, %cst_19 {dimension_numbers = #tpu.dot_dimension_numbers<[2], [1], [1], [2], [0, 0, 0, 1, 1, 2], [0], [0]>} : vector<4x16x16xbf16>, vector<4x16x10xbf16>, vector<4x16x10xf32> -> vector<4x16x10xf32>
    "tpu.trace_stop"() : () -> ()
    %20 = vector.shape_cast %19 : vector<4x16x10xf32> to vector<64x10xf32>
    %21 = arith.truncf %20 : vector<64x10xf32> to vector<64x10xbf16>
    %cst_20 = arith.constant dense<0.000000e+00> : vector<64x20xf32>
    %22 = tpu.matmul %21, %6, %cst_20 {dimension_numbers = #tpu.dot_dimension_numbers<[1], [0], [0], [1], [0, 0, 1, 1], [], []>} : vector<64x10xbf16>, vector<10x20xbf16>, vector<64x20xf32> -> vector<64x20xf32>
    %23 = arith.addf %17, %22 : vector<64x20xf32>
    %24 = vector.broadcast %13 : vector<1x20xf32> to vector<64x20xf32>
    %25 = arith.addf %23, %24 : vector<64x20xf32>
    %cst_21 = arith.constant 0.000000e+00 : f32
    %26 = vector.broadcast %cst_21 : f32 to vector<64x20xf32>
    %27 = arith.maximumf %25, %26 : vector<64x20xf32>
    %28 = arith.truncf %27 : vector<64x20xf32> to vector<64x20xbf16>
    %cst_22 = arith.constant dense<0.000000e+00> : vector<64x20xf32>
    %29 = tpu.matmul %28, %7, %cst_22 {dimension_numbers = #tpu.dot_dimension_numbers<[1], [0], [0], [1], [0, 0, 1, 1], [], []>} : vector<64x20xbf16>, vector<20x20xbf16>, vector<64x20xf32> -> vector<64x20xf32>
    %30 = vector.shape_cast %28 : vector<64x20xbf16> to vector<4x16x20xbf16>
    "tpu.trace_start"() <{level = 10 : i32, message = "gij,gjf->gif"}> : () -> ()
    %cst_23 = arith.constant dense<0.000000e+00> : vector<4x16x20xf32>
    %31 = tpu.matmul %1, %30, %cst_23 {dimension_numbers = #tpu.dot_dimension_numbers<[2], [1], [1], [2], [0, 0, 0, 1, 1, 2], [0], [0]>} : vector<4x16x16xbf16>, vector<4x16x20xbf16>, vector<4x16x20xf32> -> vector<4x16x20xf32>
    "tpu.trace_stop"() : () -> ()
    %32 = vector.shape_cast %31 : vector<4x16x20xf32> to vector<64x20xf32>
    %33 = arith.truncf %32 : vector<64x20xf32> to vector<64x20xbf16>
    %cst_24 = arith.constant dense<0.000000e+00> : vector<64x20xf32>
    %34 = tpu.matmul %33, %8, %cst_24 {dimension_numbers = #tpu.dot_dimension_numbers<[1], [0], [0], [1], [0, 0, 1, 1], [], []>} : vector<64x20xbf16>, vector<20x20xbf16>, vector<64x20xf32> -> vector<64x20xf32>
    %35 = arith.addf %29, %34 : vector<64x20xf32>
    %36 = vector.broadcast %14 : vector<1x20xf32> to vector<64x20xf32>
    %37 = arith.addf %35, %36 : vector<64x20xf32>
    %cst_25 = arith.constant 0.000000e+00 : f32
    %38 = vector.broadcast %cst_25 : f32 to vector<64x20xf32>
    %39 = arith.maximumf %37, %38 : vector<64x20xf32>
    %40 = arith.truncf %39 : vector<64x20xf32> to vector<64x20xbf16>
    %cst_26 = arith.constant dense<0.000000e+00> : vector<64x20xf32>
    %41 = tpu.matmul %40, %9, %cst_26 {dimension_numbers = #tpu.dot_dimension_numbers<[1], [0], [0], [1], [0, 0, 1, 1], [], []>} : vector<64x20xbf16>, vector<20x20xbf16>, vector<64x20xf32> -> vector<64x20xf32>
    %42 = vector.shape_cast %40 : vector<64x20xbf16> to vector<4x16x20xbf16>
    "tpu.trace_start"() <{level = 10 : i32, message = "gij,gjf->gif"}> : () -> ()
    %cst_27 = arith.constant dense<0.000000e+00> : vector<4x16x20xf32>
    %43 = tpu.matmul %1, %42, %cst_27 {dimension_numbers = #tpu.dot_dimension_numbers<[2], [1], [1], [2], [0, 0, 0, 1, 1, 2], [0], [0]>} : vector<4x16x16xbf16>, vector<4x16x20xbf16>, vector<4x16x20xf32> -> vector<4x16x20xf32>
    "tpu.trace_stop"() : () -> ()
    %44 = vector.shape_cast %43 : vector<4x16x20xf32> to vector<64x20xf32>
    %45 = arith.truncf %44 : vector<64x20xf32> to vector<64x20xbf16>
    %cst_28 = arith.constant dense<0.000000e+00> : vector<64x20xf32>
    %46 = tpu.matmul %45, %10, %cst_28 {dimension_numbers = #tpu.dot_dimension_numbers<[1], [0], [0], [1], [0, 0, 1, 1], [], []>} : vector<64x20xbf16>, vector<20x20xbf16>, vector<64x20xf32> -> vector<64x20xf32>
    %47 = arith.addf %41, %46 : vector<64x20xf32>
    %48 = vector.broadcast %15 : vector<1x20xf32> to vector<64x20xf32>
    %49 = arith.addf %47, %48 : vector<64x20xf32>
    %cst_29 = arith.constant 0.000000e+00 : f32
    %50 = vector.broadcast %cst_29 : f32 to vector<64x20xf32>
    %51 = arith.maximumf %49, %50 : vector<64x20xf32>
    %52 = vector.shape_cast %51 : vector<64x20xf32> to vector<4x16x20xf32>
    %cst_30 = arith.constant dense<0xFF800000> : vector<4x20xf32>
    %53 = vector.multi_reduction <maximumf>, %52, %cst_30 [1] : vector<4x16x20xf32> to vector<4x20xf32>
    %cst_31 = arith.constant dense<0.000000e+00> : vector<4x20xf32>
    %54 = vector.multi_reduction <add>, %52, %cst_31 [1] : vector<4x16x20xf32> to vector<4x20xf32>
    %cst_32 = arith.constant 1.600000e+01 : f32
    %55 = vector.broadcast %cst_32 : f32 to vector<4x20xf32>
    %56 = arith.divf %54, %55 : vector<4x20xf32>
    %57 = arith.truncf %53 : vector<4x20xf32> to vector<4x20xbf16>
    %cst_33 = arith.constant dense<0.000000e+00> : vector<4x128xf32>
    %58 = tpu.matmul %57, %11, %cst_33 {dimension_numbers = #tpu.dot_dimension_numbers<[1], [0], [0], [1], [0, 0, 1, 1], [], []>} : vector<4x20xbf16>, vector<20x128xbf16>, vector<4x128xf32> -> vector<4x128xf32>
    %59 = arith.truncf %56 : vector<4x20xf32> to vector<4x20xbf16>
    %cst_34 = arith.constant dense<0.000000e+00> : vector<4x128xf32>
    %60 = tpu.matmul %59, %12, %cst_34 {dimension_numbers = #tpu.dot_dimension_numbers<[1], [0], [0], [1], [0, 0, 1, 1], [], []>} : vector<4x20xbf16>, vector<20x128xbf16>, vector<4x128xf32> -> vector<4x128xf32>
    %61 = arith.addf %58, %60 : vector<4x128xf32>
    %62 = vector.broadcast %16 : vector<1x128xf32> to vector<4x128xf32>
    %63 = arith.addf %61, %62 : vector<4x128xf32>
    %c0_35 = arith.constant 0 : index
    %c0_36 = arith.constant 0 : index
    %c0_37 = arith.constant 0 : index
    %64 = vector.load %arg5[%c0_35, %c0_36, %c0_37] : memref<1x4x128xf32, #tpu.memory_space<vmem>>, vector<1x4x128xf32>
    %65 = vector.shape_cast %64 : vector<1x4x128xf32> to vector<4x128xf32>
    %66 = vector.shape_cast %63 : vector<4x128xf32> to vector<1x4x128xf32>
    tpu.vector_store %arg5[%c0_35, %c0_36, %c0_37], %66 {strides = array<i32>} : memref<1x4x128xf32, #tpu.memory_space<vmem>>, vector<1x4x128xf32>,
    return
  }
  func.func @transform_0(%arg0: i32) -> (i32, i32, i32) {
    %c0_i32 = arith.constant 0 : i32
    %c0_i32_0 = arith.constant 0 : i32
    %c0_i32_1 = arith.constant 0 : i32
    return %arg0, %c0_i32, %c0_i32_0 : i32, i32, i32
  }
  func.func @transform_1(%arg0: i32) -> (i32, i32, i32) {
    %c0_i32 = arith.constant 0 : i32
    %c0_i32_0 = arith.constant 0 : i32
    %c0_i32_1 = arith.constant 0 : i32
    return %arg0, %c0_i32, %c0_i32_0 : i32, i32, i32
  }
  func.func @transform_2(%arg0: i32) -> (i32, i32) {
    %c0_i32 = arith.constant 0 : i32
    %c0_i32_0 = arith.constant 0 : i32
    %c0_i32_1 = arith.constant 0 : i32
    return %c0_i32, %c0_i32_0 : i32, i32
  }
  func.func @transform_3(%arg0: i32) -> (i32, i32) {
    %c0_i32 = arith.constant 0 : i32
    %c0_i32_0 = arith.constant 0 : i32
    %c0_i32_1 = arith.constant 0 : i32
    return %c0_i32, %c0_i32_0 : i32, i32
  }
  func.func @transform_4(%arg0: i32) -> (i32, i32, i32) {
    %c0_i32 = arith.constant 0 : i32
    %c0_i32_0 = arith.constant 0 : i32
    %c0_i32_1 = arith.constant 0 : i32
    return %arg0, %c0_i32, %c0_i32_0 : i32, i32, i32
  }
}

</mosaic_0001>

<bundles_post_ra>
// kernel: tpu_custom_call.1
= control target key start
LH: loop header
LB: loop body
LE: loop exit
PB: predicated region body
PF: predicated region fallthrough
CT: control target
= control target key end

     0   :  { %9 = vsyncpa [#allocation3], 0  ;;  %s2497_s0 = inlined_call_operand.vmem [shape: f32[8,16,16], index: 0, kind: input, shape index: {}]   ;;  %s2498_s1 = inlined_call_operand.vmem [shape: f32[8,16,10], index: 1, kind: input, shape index: {}]   ;;  %s2499_s2 = inlined_call_operand.hbm [shape: bf16[224,128], index: 2, kind: input, shape index: {}]   ;;  %s2500_s3 = inlined_call_operand.vmem [shape: f32[8,128], index: 3, kind: input, shape index: {}]   ;;  %s2501_s4 = inlined_call_operand.hbm [shape: f32[2,4,128], index: 4, kind: output, shape index: {}]  }
   0x1   :  { %10 = vsyncpa [#allocation4], 0 }
   0x2   :  { %12 = vsyncpa [#allocation4 + $0x1], 0  ;;  %s2224_s15 = smov 0   ;;  %s2226_s16 = smov 0  }
   0x3   :  { %s2228_s17 = smov 0   ;;  %s2230_s18 = smov 0  }
   0x4 LB: > { %s2245_s19 = sadd.s32 4294967295, %s2191_s18   ;;  %s1732_s20 = sadd.s32 4294967294, %s2191_s18   ;;  %s2191_s18 = sphi %s2230_s18, %s2509_s18   ;;  %s2187_s17 = sphi %s2228_s17, %s2508_s17   ;;  %s2183_s16 = sphi %s2226_s16, %s2507_s16   ;;  %s2179_s15 = sphi %s2224_s15, %s2506_s15  }
   0x5   : > { %s2249_s21 = sadd.s32 1, %s2191_s18   ;;  %s119_s22 = sadd.s32 1, %s2187_s17 }
   0x6   : > { %s116_s23 = ssub.s32 %s2191_s18, %s2249_s21  ;;  %p129_p0 = scmp.ne.s32.totalorder %s2187_s17, %s2183_s16 }
   0x7   : > { %p117_p1 = scmp.eq.s32.totalorder %s116_s23, 0  ;;  %p130_p2 = scmp.eq.s32.totalorder %s2245_s19, 1 }
   0x8   : > { %p135_p3 = scmp.ne.s32.totalorder %s2183_s16, %s2179_s15  ;;  %p136_p4 = scmp.eq.s32.totalorder %s1732_s20, 1 }
   0x9   : > { %s2260_s24 = scalar_select %p117_p1, %s2187_s17, %s119_s22  }
   0xa   : > { %p2262_p5 = por %p130_p2, %p129_p0  ;;  %p2266_p6 = por %p136_p4, %p135_p3 }
   0xb   : > { %p1733_p7 = scmp.ge.s32.totalorder %s2191_s18, 1  ;;  %p143_p8 = scmp.lt.s32.totalorder %s2191_s18, 3 }
   0xc   : > { %s2503_s26 = scalar_select %p2266_p6, 1, 0 }
   0xd   : > { %p2047_p9 = scmp.eq.s32.totalorder %s2245_s19, 0  ;;  %p2273_p10 = pnand %p1733_p7, %p143_p8 }
   0xe   : > { %s2193_s28 = smov [#allocation2]  }
   0xf   : > { %s155_s29 = sshll.u32 %s2193_s28, 4  ;;  %p2039_p11 = pneg %p2273_p10  ;;  %s156_s29 = int_to_ptr.vmem [resolvable:$true] %s155_s29 }
  0x10   : > { %s2112_s30 = scalar_lea.vmem %s156_s29, 1792  ;;  %p2120_p3 = scmp.lt.s32.totalorder %s156_s29, %s156_s29 }
  0x11   : > { %p2040_p12 = pnand %p2047_p9, %p2039_p11  ;;  %p2113_p0 = scmp.ne.s32.totalorder %s156_s29, %s2112_s30 }
  0x12   : > { %p2121_p4 = scmp.lt.s32.totalorder %s2112_s30, %s2112_s30 }
  0x13   : > { %p2103_p13 = pneg %p2040_p12 }
  0x14   : > { %p2122_p6 = por %p2121_p4, %p2120_p3 }
  0x15   : > { %p2115_p1 = pnand %p2113_p0, %p2103_p13 }
  0x17   : > { %p2116_p2 = pneg %p2115_p1 }
  0x19   : > { %p2123_p7 = pnand %p2122_p6, %p2116_p2 }
  0x1b   : > { %2126 = shalt.err (!%p2123_p7)
}
  0x1c   : > { %s2194_s5 = smov 64   ;;  %s2195_s6 = smov 4  }
  0x1d   : > { %2042 = dma.hbm_to_vmem [thread:$0]  (!%p2040_p12), %s2499_s2, 1792, %s156_s29, [#allocation3], %s2194_s5, %s2194_s5, %s2195_s6  }
  0x1e   : > { %194 = sbr.rel (%p2273_p10) target bundleno = 1518 (0x5ee), region = 36 }
  0x23   : > { %2170 = dma.done.wait (%p2047_p9), [#allocation3], 1792  }
  0x24   : > { %2172 = vsyncadd (%p2047_p9), [#allocation3], 4294965504  ;;  %s1739_s9 = sshll.u32 %s2245_s19, 2  ;;  %v2196_v0 = vmov 0.0   ;;  %vm2197_vm0 = vmmov 0   ;;  %vm292_vm1 = vcmask 130048  }
  0x25   : > { %1871 = vmatprep.subr.bf16.mxu0 %v2196_v0  ;;  %1877 = vmatprep.subr.bf16.mxu1 %v2196_v0  ;;  %p228_p6 = scmp.lt.s32.totalorder %s1739_s9, 7  ;;  %vm491_vm2 = vcmask 1044480   ;;  %v2087_v22 = vld [vmem:[#allocation2] sm:$0x1f]   ;;  %vm478_vm3 = vcmask 80896   ;;  %vm859_vm4 = vcmask 1041408  }
  0x26   : > { %1873 = vmatprep.mubr.msk.bf16.mxu0 %vm2197_vm0, %v2196_v0  ;;  %1879 = vmatprep.mubr.msk.bf16.mxu1 %vm2197_vm0, %v2196_v0  ;;  %v578_v26 = vsel %vm491_vm2, %v2087_v22, 0  ;;  %v2088_v27 = vld [vmem:[#allocation2 + $0x8] sm:$0x1f]   ;;  %v1759_v55 = vld [vmem:[%s2500_s3] ss:$0 sm:$0xff]  ;;  %vm846_vm5 = vcmask 162816  }
  0x27   : > { %s2511_s9 = smov (!%p228_p6, %s1739_s9), 7  ;;  %v493_v28 = vsel %vm491_vm2, %v2088_v27, 0  ;;  %vm1500_vm6 = vcmask 1041409   ;;  %vm1502_vm7 = vcmask 1042434   ;;  %vm1504_vm8 = vcmask 1043459   ;;  %s224_s6 = sand.u32 1, %s2183_s16  }
  0x28   : > { %s1805_s10 = sshll.u32 %s2511_s9, 4  ;;  %s1738_s7 = sshll.u32 %s224_s6, 2 }
  0x29   : > { %s2300_s13 = scalar_lea.vmem %s2497_s0, %s1805_s10  ;;  %s239_s22 = scalar_lea.vmem %s2498_s1, %s1805_s10 }
  0x2a   : > { %v254_v1 = vld [vmem:[%s239_s22] sm:$0xff]  ;;  %v255_v2 = vld [vmem:[%s239_s22 + $0x8] sm:$0xff]  ;;  %v256_v3 = vld [vmem:[%s239_s22 + $0x10] sm:$0xff]  ;;  %s1802_s10 = sshll.u32 %s2245_s19, 6  ;;  %s226_s11 = scalar_lea.vmem [#allocation5], %s1738_s7 }
  0x2b   : > { %v262_v4 = vpack.c.bf16 %v255_v2, %v254_v1  ;;  %v257_v5 = vld [vmem:[%s239_s22 + $0x18] sm:$0xff]  ;;  %v242_v6 = vld [vmem:[%s2300_s13] sm:$0xff]  ;;  %v243_v7 = vld [vmem:[%s2300_s13 + $0x8] sm:$0xff]  ;;  %s1649_s12 = sshll.u32 %s226_s11, 4  ;;  %s2456_s20 = scalar_lea.hbm %s2501_s4, %s1802_s10  ;;  %s2458_s12 = int_to_ptr.vmem [resolvable:$true] %s1649_s12 }
  0x2c   : > { %v263_v8 = vpack.c.bf16 %v257_v5, %v256_v3  ;;  %v2307_v9 = vpack.c.bf16 %v243_v7, %v242_v6  ;;  %v244_v10 = vld [vmem:[%s2300_s13 + $0x10] sm:$0xff]  ;;  %v245_v11 = vld [vmem:[%s2300_s13 + $0x18] sm:$0xff]  ;;  %v258_v12 = vld [vmem:[%s239_s22 + $0x20] sm:$0xff]  ;;  %s1636_s19 = scalar_lea.sflag [#allocation4], %s224_s6  ;;  %s2198_s23 = smov [#allocation5]  }
  0x2d   : > { %1872 = vmatpush3.bf16.msra.mxu0 %v262_v4  ;;  %v2311_v13 = vpack.c.bf16 %v245_v11, %v244_v10  ;;  %v259_v14 = vld [vmem:[%s239_s22 + $0x28] sm:$0xff]  ;;  %v260_v15 = vld [vmem:[%s239_s22 + $0x30] sm:$0xff]  ;;  %v261_v16 = vld [vmem:[%s239_s22 + $0x38] sm:$0xff]  ;;  %s2127_s22 = scalar_lea.vmem %s2458_s12, 64  ;;  %s2131_s27 = sshll.u32 %s2198_s23, 4  ;;  %s2132_s27 = int_to_ptr.vmem [resolvable:$false] %s2131_s27 }
  0x2e   : > { %1878 = vmatpush3.bf16.msra.mxu1 %v263_v8  ;;  %1883 = vmatprep.subr.bf16.mxu0 %v2196_v0  ;;  %v264_v17 = vpack.c.bf16 %v259_v14, %v258_v12  ;;  %v265_v18 = vpack.c.bf16 %v261_v16, %v260_v15  ;;  %v246_v19 = vld [vmem:[%s2300_s13 + $0x20] sm:$0xff]  ;;  %v247_v20 = vld [vmem:[%s2300_s13 + $0x28] sm:$0xff]  ;;  %v248_v21 = vld [vmem:[%s2300_s13 + $0x30] sm:$0xff]  ;;  %p2128_p8 = scmp.ne.s32.totalorder %s2458_s12, %s2127_s22  ;;  %s2133_s28 = scalar_lea.vmem %s2132_s27, 128 }
  0x2f   : > { %1889 = vmatprep.subr.bf16.mxu1 %v2196_v0  ;;  %v249_v23 = vld [vmem:[%s2300_s13 + $0x38] sm:$0xff]  ;;  %v2328_v24 = vpack.c.bf16 %v247_v20, %v246_v19  ;;  %p2134_p11 = scmp.lt.s32.totalorder %s2458_s12, %s2132_s27  ;;  %p2135_p12 = scmp.lt.s32.totalorder %s2133_s28, %s2127_s22 }
  0x30   : > { %1874 = vmatmul.mubr.msk.bf16.vlgmr.msra.gmra.mxu0 %vm292_vm1, %v2307_v9  ;;  %v2330_v25 = vpack.c.bf16 %v249_v23, %v248_v21  ;;  %p2129_p9 = pnand %p2128_p8, %p2262_p5 }
  0x31   : > { %1880 = vmatmul.mubr.msk.bf16.vlgmr.msra.gmra.mxu1 %vm292_vm1, %v2311_v13  ;;  %1884 = vmatpush3.bf16.msra.mxu0 %v264_v17  ;;  %p2136_p13 = por %p2135_p12, %p2134_p11 }
  0x32   : > { %1890 = vmatpush3.bf16.msra.mxu1 %v265_v18  ;;  %1885 = vmatprep.mubr.msk.bf16.mxu0 %vm2197_vm0, %v2196_v0  ;;  %p2130_p10 = pneg %p2129_p9 }
  0x33   : > { %1891 = vmatprep.mubr.msk.bf16.mxu1 %vm2197_vm0, %v2196_v0  ;;  %2028 = vmatprep.subr.msk.bf16.mxu1 %vm491_vm2, %v2087_v22 }
  0x34   : > { %2027 = vmatprep.subr.msk.bf16.mxu0 %vm491_vm2, %v2088_v27  ;;  %p2137_p0 = pnand %p2136_p13, %p2130_p10 }
  0x38   : > { %1886 = vmatmul.mubr.msk.bf16.vlgmr.msra.gmra.mxu0 %vm292_vm1, %v2328_v24 }
  0x39   : > { %1892 = vmatmul.mubr.msk.bf16.vlgmr.msra.gmra.mxu1 %vm292_vm1, %v2330_v25  ;;  %1896 = vmatpush3.bf16.msra.mxu0 %v493_v28 }
  0x3a   : > { %1906 = vmatpush3.bf16.msra.mxu1 %v578_v26  ;;  %1907 = vmatprep.mubr.msk.bf16.mxu1 %vm478_vm3, %v262_v4 }
  0x3b   : > { %1921 = vmatprep.subr.bf16.mxu1 %v2196_v0  ;;  %1915 = vmatprep.subr.bf16.mxu0 %v2196_v0 }
  0x41   : > { %1908 = vmatmul.mubr.msk.bf16.vlgmr.msra.gmra.mxu1 %vm478_vm3, %v263_v8 }
  0x42   : > { %1911 = vmatprep.mubr.msk.bf16.mxu1 %vm478_vm3, %v264_v17 }
  0x49   : > { %1912 = vmatmul.mubr.msk.bf16.gmra.mxu1 %vm478_vm3, %v265_v18 }
  0x4a   : > { %1923 = vmatprep.mubr.msk.bf16.mxu1 %vm2197_vm0, %v2196_v0 }
  0xf0   : > { %v330_v29 = vpop.f32.mrf.mxu0 }
  0xf1   : > { %v374_v30 = vpop.f32.mrf.mxu1 }
  0xf2   : > { %v1875_v31 = vpop.f32.mrf.mxu0 }
  0xf3   : > { %v1881_v32 = vpop.f32.mrf.mxu1  ;;  %v2089_v31 = vld [vmem:[#allocation2 + $0x18] ss:$0 sps:$4 sm:$0x33]  }
  0xf4   : > { %v333_v33 = vpop.f32.mrf.mxu0 }
  0xf5   : > { %v469_v34 = vpack.c.bf16 %v333_v33, %v330_v29  ;;  %v377_v35 = vpop.f32.mrf.mxu1 }
  0xf6   : > { %v470_v36 = vpack.c.bf16 %v377_v35, %v374_v30  ;;  %v1876_v37 = vpop.f32.mrf.mxu0 }
  0xf7   : > { %v1882_v38 = vpop.f32.mrf.mxu1  ;;  %1897 = vmatprep.mubr.msk.bf16.mxu0 %vm478_vm3, %v469_v34  ;;  %v2090_v37 = vld [vmem:[#allocation2 + $0x10] sm:$0xff]  }
  0xf8   : > { %v418_v39 = vpop.f32.mrf.mxu0  ;;  %1898 = vmatmul.mubr.msk.bf16.vlgmr.msra.gmra.mxu0 %vm478_vm3, %v470_v36  ;;  %v950_v36 = vsel %vm859_vm4, %v2089_v31, 0  ;;  %v2091_v38 = vld [vmem:[#allocation2 + $0x28] ss:$0 sps:$4 sm:$0x33]  }
  0xf9   : > { %v462_v40 = vpop.f32.mrf.mxu1 }
  0xfa   : > { %v1887_v41 = vpop.f32.mrf.mxu0 }
  0xfb   : > { %v1893_v42 = vpop.f32.mrf.mxu1 }
  0xfc   : > { %v421_v43 = vpop.f32.mrf.mxu0 }
  0xfd   : > { %v471_v44 = vpack.c.bf16 %v421_v43, %v418_v39  ;;  %v465_v45 = vpop.f32.mrf.mxu1  ;;  %v861_v39 = vsel %vm859_vm4, %v2091_v38, 0 }
  0xfe   : > { %v472_v46 = vpack.c.bf16 %v465_v45, %v462_v40  ;;  %v1888_v47 = vpop.f32.mrf.mxu0  ;;  %v2092_v40 = vld [vmem:[#allocation2 + $0x20] sm:$0xff]  }
  0xff   : > { %1901 = vmatprep.mubr.msk.bf16.mxu0 %vm478_vm3, %v471_v44  ;;  %v1894_v48 = vpop.f32.mrf.mxu1 }
 0x100   : > { %1902 = vmatmul.mubr.msk.bf16.gmra.mxu0 %vm478_vm3, %v472_v46 }
 0x101   : > { %1917 = vmatprep.mubr.msk.bf16.mxu0 %vm2197_vm0, %v2196_v0  ;;  %v1909_v49 = vpop.f32.mrf.mxu1 }
 0x103   : > { %v614_v50 = vpop.f32.mrf.mxu1 }
 0x105   : > { %v1910_v51 = vpop.f32.mrf.mxu1 }
 0x107   : > { %v617_v52 = vpop.f32.mrf.mxu1 }
 0x109   : > { %v1913_v57 = vpop.f32.mrf.mxu1 }
 0x10b   : > { %v630_v63 = vpop.f32.mrf.mxu1 }
 0x10d   : > { %v1914_v11 = vpop.f32.mrf.mxu1 }
 0x10f   : > { %v633_v22 = vpop.f32.mrf.mxu1 }
 0x1b8   : > { %v1899_v53 = vpop.f32.mrf.mxu0 }
 0x1b9   : > { %v623_v54 = vadd.f32 %v1909_v49, %v1899_v53 }
 0x1ba   : > { %v529_v56 = vpop.f32.mrf.mxu0 }
 0x1bb   : > { %v615_v58 = vadd.f32 %v614_v50, %v529_v56  ;;  %v651_v60 = vadd.f32 %v1759_v55, %v623_v54 }
 0x1bc   : > { %v1900_v59 = vpop.f32.mrf.mxu0 }
 0x1bd   : > { %v626_v61 = vadd.f32 %v1910_v51, %v1900_v59  ;;  %v649_v1 = vadd.f32 %v1759_v55, %v615_v58  ;;  %v659_v5 = vmax.f32 %v651_v60, 0.0 }
 0x1be   : > { %v532_v62 = vpop.f32.mrf.mxu0 }
 0x1bf   : > { %v652_v2 = vadd.f32 %v1759_v55, %v626_v61  ;;  %v618_v3 = vadd.f32 %v617_v52, %v532_v62  ;;  %v657_v12 = vmax.f32 %v649_v1, 0.0 }
 0x1c0   : > { %v1903_v4 = vpop.f32.mrf.mxu0 }
 0x1c1   : > { %v660_v6 = vmax.f32 %v652_v2, 0.0  ;;  %v650_v7 = vadd.f32 %v1759_v55, %v618_v3  ;;  %v639_v8 = vadd.f32 %v1913_v57, %v1903_v4 }
 0x1c2   : > { %v545_v10 = vpop.f32.mrf.mxu0 }
 0x1c3   : > { %v666_v14 = vpack.c.bf16 %v660_v6, %v659_v5  ;;  %v658_v15 = vmax.f32 %v650_v7, 0.0  ;;  %v631_v16 = vadd.f32 %v630_v63, %v545_v10  ;;  %v655_v19 = vadd.f32 %v1759_v55, %v639_v8  ;;  %v1776_v5 = vld [vmem:[%s2500_s3 + $0x1] ss:$0 sm:$0xff] }
 0x1c4   : > { %v1904_v17 = vpop.f32.mrf.mxu0 }
 0x1c5   : > { %v665_v18 = vpack.c.bf16 %v658_v15, %v657_v12  ;;  %v642_v20 = vadd.f32 %v1914_v11, %v1904_v17  ;;  %1922 = vmatpush3.bf16.msra.mxu1 %v666_v14  ;;  %v653_v23 = vadd.f32 %v1759_v55, %v631_v16  ;;  %v663_v28 = vmax.f32 %v655_v19, 0.0 }
 0x1c6   : > { %v548_v21 = vpop.f32.mrf.mxu0  ;;  %1933 = vmatprep.subr.bf16.mxu1 %v2196_v0 }
 0x1c7   : > { %v656_v26 = vadd.f32 %v1759_v55, %v642_v20  ;;  %v634_v27 = vadd.f32 %v633_v22, %v548_v21  ;;  %1916 = vmatpush3.bf16.msra.mxu0 %v665_v18  ;;  %v661_v32 = vmax.f32 %v653_v23, 0.0 }
 0x1c8   : > { %1924 = vmatmul.mubr.msk.bf16.vlgmr.msra.gmra.mxu1 %vm292_vm1, %v2311_v13  ;;  %1927 = vmatprep.subr.bf16.mxu0 %v2196_v0 }
 0x1c9   : > { %v664_v29 = vmax.f32 %v656_v26, 0.0  ;;  %v654_v30 = vadd.f32 %v1759_v55, %v634_v27  ;;  %1935 = vmatprep.mubr.msk.bf16.mxu1 %vm2197_vm0, %v2196_v0 }
 0x1ca   : > { %1918 = vmatmul.mubr.msk.bf16.vlgmr.msra.gmra.mxu0 %vm292_vm1, %v2307_v9 }
 0x1cb   : > { %v668_v33 = vpack.c.bf16 %v664_v29, %v663_v28  ;;  %v662_v34 = vmax.f32 %v654_v30, 0.0  ;;  %1929 = vmatprep.mubr.msk.bf16.mxu0 %vm2197_vm0, %v2196_v0 }
 0x1cd   : > { %v667_v35 = vpack.c.bf16 %v662_v34, %v661_v32  ;;  %1934 = vmatpush3.bf16.msra.mxu1 %v668_v33 }
 0x1ce   : > { %2030 = vmatprep.subr.msk.bf16.mxu1 %vm859_vm4, %v2089_v31 }
 0x1cf   : > { %1928 = vmatpush3.bf16.msra.mxu0 %v667_v35 }
 0x1d0   : > { %1936 = vmatmul.mubr.msk.bf16.vlgmr.msra.gmra.mxu1 %vm292_vm1, %v2330_v25  ;;  %2029 = vmatprep.subr.msk.bf16.mxu0 %vm859_vm4, %v2091_v38 }
 0x1d1   : > { %1952 = vmatpush3.bf16.msra.mxu1 %v950_v36  ;;  %1955 = vmatprep.mubr.msk.bf16.mxu1 %vm846_vm5, %v665_v18 }
 0x1d2   : > { %1930 = vmatmul.mubr.msk.bf16.vlgmr.msra.gmra.mxu0 %vm292_vm1, %v2328_v24  ;;  %1953 = vmatprep.subr.bf16.mxu1 %v2090_v37 }
 0x1d3   : > { %1940 = vmatpush3.bf16.msra.mxu0 %v861_v39 }
 0x1d4   : > { %1941 = vmatprep.subr.bf16.mxu0 %v2092_v40 }
 0x1d5   : > { %1954 = vmatpush3.bf16.msra.mxu1 %v2090_v37 }
 0x1d6   : > { %1969 = vmatprep.subr.bf16.mxu1 %v2196_v0 }
 0x1d7   : > { %1942 = vmatpush3.bf16.msra.mxu0 %v2092_v40 }
 0x1d8   : > { %1956 = vmatmul.mubr.msk.bf16.vlgmr.msra.gmra.mxu1 %vm846_vm5, %v666_v14  ;;  %1963 = vmatprep.subr.bf16.mxu0 %v2196_v0 }
 0x1d9   : > { %1959 = vmatprep.mubr.msk.bf16.mxu1 %vm846_vm5, %v667_v35 }
 0x1e0   : > { %1960 = vmatmul.mubr.msk.bf16.gmra.mxu1 %vm846_vm5, %v668_v33 }
 0x1e1   : > { %1971 = vmatprep.mubr.msk.bf16.mxu1 %vm2197_vm0, %v2196_v0 }
 0x288   : > { %v744_v41 = vpop.f32.mrf.mxu1 }
 0x28a   : > { %v703_v42 = vpop.f32.mrf.mxu0  ;;  %v1925_v43 = vpop.f32.mrf.mxu1 }
 0x28b   : > { %v2093_v43 = vld [vmem:[#allocation2 + $0x38] ss:$0 sps:$4 sm:$0x33]  }
 0x28c   : > { %v1919_v44 = vpop.f32.mrf.mxu0  ;;  %v747_v45 = vpop.f32.mrf.mxu1 }
 0x28d   : > { %v834_v49 = vpack.c.bf16 %v747_v45, %v744_v41 }
 0x28e   : > { %v706_v46 = vpop.f32.mrf.mxu0  ;;  %v1926_v47 = vpop.f32.mrf.mxu1 }
 0x28f   : > { %v833_v48 = vpack.c.bf16 %v706_v46, %v703_v42 }
 0x290   : > { %v1920_v50 = vpop.f32.mrf.mxu0  ;;  %v826_v51 = vpop.f32.mrf.mxu1 }
 0x291   : > { %1943 = vmatprep.mubr.msk.bf16.mxu0 %vm846_vm5, %v833_v48  ;;  %v2094_v48 = vld [vmem:[#allocation2 + $0x30] sm:$0xff]  }
 0x292   : > { %v785_v52 = vpop.f32.mrf.mxu0  ;;  %v1937_v53 = vpop.f32.mrf.mxu1  ;;  %1944 = vmatmul.mubr.msk.bf16.vlgmr.msra.gmra.mxu0 %vm846_vm5, %v834_v49 }
 0x294   : > { %v1931_v54 = vpop.f32.mrf.mxu0  ;;  %v829_v55 = vpop.f32.mrf.mxu1 }
 0x295   : > { %v836_v59 = vpack.c.bf16 %v829_v55, %v826_v51 }
 0x296   : > { %v788_v56 = vpop.f32.mrf.mxu0  ;;  %v1938_v57 = vpop.f32.mrf.mxu1 }
 0x297   : > { %v835_v58 = vpack.c.bf16 %v788_v56, %v785_v52 }
 0x298   : > { %v1932_v60 = vpop.f32.mrf.mxu0  ;;  %v1957_v61 = vpop.f32.mrf.mxu1 }
 0x299   : > { %1947 = vmatprep.mubr.msk.bf16.mxu0 %vm846_vm5, %v835_v58 }
 0x29a   : > { %1948 = vmatmul.mubr.msk.bf16.gmra.mxu0 %vm846_vm5, %v836_v59  ;;  %v986_v62 = vpop.f32.mrf.mxu1 }
 0x29b   : > { %1965 = vmatprep.mubr.msk.bf16.mxu0 %vm2197_vm0, %v2196_v0 }
 0x29c   : > { %v1958_v63 = vpop.f32.mrf.mxu1 }
 0x29e   : > { %v989_v1 = vpop.f32.mrf.mxu1 }
 0x2a0   : > { %v1961_v4 = vpop.f32.mrf.mxu1 }
 0x2a2   : > { %v1002_v12 = vpop.f32.mrf.mxu1 }
 0x2a4   : > { %v1962_v23 = vpop.f32.mrf.mxu1 }
 0x2a6   : > { %v1005_v35 = vpop.f32.mrf.mxu1 }
 0x352   : > { %v1945_v2 = vpop.f32.mrf.mxu0 }
 0x353   : > { %v995_v3 = vadd.f32 %v1957_v61, %v1945_v2 }
 0x354   : > { %v897_v6 = vpop.f32.mrf.mxu0 }
 0x355   : > { %v987_v7 = vadd.f32 %v986_v62, %v897_v6  ;;  %v1023_v10 = vadd.f32 %v1776_v5, %v995_v3  ;;  %v2097_v6 = vld [vmem:[#allocation2 + $0x58] ss:$0 sps:$4 sm:$0x33]  }
 0x356   : > { %v1946_v8 = vpop.f32.mrf.mxu0 }
 0x357   : > { %v998_v11 = vadd.f32 %v1958_v63, %v1946_v8  ;;  %v1021_v15 = vadd.f32 %v1776_v5, %v987_v7  ;;  %v1031_v19 = vmax.f32 %v1023_v10, 0.0  ;;  %v1587_v7 = vsel %vm859_vm4, %v2097_v6, 0  ;;  %v2098_v8 = vld [vmem:[#allocation2 + $0x68] ss:$0 sps:$4 sm:$0x33]  }
 0x358   : > { %v900_v14 = vpop.f32.mrf.mxu0  ;;  %v1520_v10 = vsel %vm859_vm4, %v2098_v8, 0 }
 0x359   : > { %v1024_v16 = vadd.f32 %v1776_v5, %v998_v11  ;;  %v990_v17 = vadd.f32 %v989_v1, %v900_v14  ;;  %v1029_v27 = vmax.f32 %v1021_v15, 0.0  ;;  %v2099_v11 = vld [vmem:[#allocation2 + $0x50] sm:$0xff]  }
 0x35a   : > { %v1949_v18 = vpop.f32.mrf.mxu0 }
 0x35b   : > { %v1032_v20 = vmax.f32 %v1024_v16, 0.0  ;;  %v1022_v21 = vadd.f32 %v1776_v5, %v990_v17  ;;  %v1011_v22 = vadd.f32 %v1961_v4, %v1949_v18  ;;  %v1793_v18 = vld [vmem:[%s2500_s3 + $0x2] ss:$0 sm:$0xff] }
 0x35c   : > { %v913_v26 = vpop.f32.mrf.mxu0 }
 0x35d   : > { %v1038_v28 = vpack.c.bf16 %v1032_v20, %v1031_v19  ;;  %v1030_v29 = vmax.f32 %v1022_v21, 0.0  ;;  %v1003_v30 = vadd.f32 %v1002_v12, %v913_v26  ;;  %v1027_v33 = vadd.f32 %v1776_v5, %v1011_v22  ;;  %v2100_v12 = vld [vmem:[#allocation2 + $0x60] sm:$0xff]  }
 0x35e   : > { %v1950_v31 = vpop.f32.mrf.mxu0 }
 0x35f   : > { %v1037_v32 = vpack.c.bf16 %v1030_v29, %v1029_v27  ;;  %v1014_v34 = vadd.f32 %v1962_v23, %v1950_v31  ;;  %1970 = vmatpush3.bf16.msra.mxu1 %v1038_v28  ;;  %v1025_v37 = vadd.f32 %v1776_v5, %v1003_v30  ;;  %v1035_v40 = vmax.f32 %v1027_v33, 0.0 }
 0x360   : > { %v916_v36 = vpop.f32.mrf.mxu0  ;;  %1981 = vmatprep.subr.bf16.mxu1 %v2196_v0 }
 0x361   : > { %v1028_v38 = vadd.f32 %v1776_v5, %v1014_v34  ;;  %v1006_v39 = vadd.f32 %v1005_v35, %v916_v36  ;;  %1964 = vmatpush3.bf16.msra.mxu0 %v1037_v32  ;;  %v1033_v44 = vmax.f32 %v1025_v37, 0.0 }
 0x362   : > { %1972 = vmatmul.mubr.msk.bf16.vlgmr.msra.gmra.mxu1 %vm292_vm1, %v2311_v13  ;;  %1975 = vmatprep.subr.bf16.mxu0 %v2196_v0  ;;  %v1320_v13 = vsel %vm859_vm4, %v2093_v43, 0 }
 0x363   : > { %v1036_v41 = vmax.f32 %v1028_v38, 0.0  ;;  %v1026_v42 = vadd.f32 %v1776_v5, %v1006_v39  ;;  %1983 = vmatprep.mubr.msk.bf16.mxu1 %vm2197_vm0, %v2196_v0 }
 0x364   : > { %1966 = vmatmul.mubr.msk.bf16.vlgmr.msra.gmra.mxu0 %vm292_vm1, %v2307_v9  ;;  %v2095_v9 = vld [vmem:[#allocation2 + $0x48] ss:$0 sps:$4 sm:$0x33]  }
 0x365   : > { %v1040_v45 = vpack.c.bf16 %v1036_v41, %v1035_v40  ;;  %v1034_v46 = vmax.f32 %v1026_v42, 0.0  ;;  %1977 = vmatprep.mubr.msk.bf16.mxu0 %vm2197_vm0, %v2196_v0 }
 0x367   : > { %v1039_v47 = vpack.c.bf16 %v1034_v46, %v1033_v44  ;;  %1982 = vmatpush3.bf16.msra.mxu1 %v1040_v45 }
 0x368   : > { %2032 = vmatprep.subr.msk.bf16.mxu1 %vm859_vm4, %v2093_v43 }
 0x369   : > { %1976 = vmatpush3.bf16.msra.mxu0 %v1039_v47 }
 0x36a   : > { %1984 = vmatmul.mubr.msk.bf16.vlgmr.msra.gmra.mxu1 %vm292_vm1, %v2330_v25  ;;  %2031 = vmatprep.subr.msk.bf16.mxu0 %vm859_vm4, %v2095_v9  ;;  %v1231_v25 = vsel %vm859_vm4, %v2095_v9, 0 }
 0x36b   : > { %2000 = vmatpush3.bf16.msra.mxu1 %v1320_v13  ;;  %2003 = vmatprep.mubr.msk.bf16.mxu1 %vm846_vm5, %v1037_v32 }
 0x36c   : > { %1978 = vmatmul.mubr.msk.bf16.vlgmr.msra.gmra.mxu0 %vm292_vm1, %v2328_v24  ;;  %2001 = vmatprep.subr.bf16.mxu1 %v2094_v48  ;;  %v2096_v24 = vld [vmem:[#allocation2 + $0x40] sm:$0xff]  }
 0x36d   : > { %1988 = vmatpush3.bf16.msra.mxu0 %v1231_v25 }
 0x36e   : > { %1989 = vmatprep.subr.bf16.mxu0 %v2096_v24 }
 0x36f   : > { %2002 = vmatpush3.bf16.msra.mxu1 %v2094_v48 }
 0x370   : > { %2019 = vmatprep.subr.bf16.mxu1 %v2196_v0 }
 0x371   : > { %1990 = vmatpush3.bf16.msra.mxu0 %v2096_v24 }
 0x372   : > { %2004 = vmatmul.mubr.msk.bf16.vlgmr.msra.gmra.mxu1 %vm846_vm5, %v1038_v28  ;;  %2011 = vmatprep.subr.bf16.mxu0 %v2196_v0 }
 0x373   : > { %2007 = vmatprep.mubr.msk.bf16.mxu1 %vm846_vm5, %v1039_v47  ;;  %2020 = vmatpush3.bf16.msra.mxu1 %v1587_v7 }
 0x374   : > { %2021 = vmatprep.subr.bf16.mxu1 %v2196_v0 }
 0x377   : > { %2022 = vmatpush3.bf16.msra.mxu1 %v2099_v11 }
 0x37a   : > { %2008 = vmatmul.mubr.msk.bf16.gmra.mxu1 %vm846_vm5, %v1040_v45 }
 0x37b   : > { %2023 = vmatprep.mubr.msk.bf16.mxu1 %vm2197_vm0, %v2196_v0 }
 0x422   : > { %v1116_v49 = vpop.f32.mrf.mxu1 }
 0x424   : > { %v1075_v50 = vpop.f32.mrf.mxu0  ;;  %v1973_v51 = vpop.f32.mrf.mxu1 }
 0x426   : > { %v1967_v52 = vpop.f32.mrf.mxu0  ;;  %v1119_v53 = vpop.f32.mrf.mxu1 }
 0x427   : > { %v1206_v57 = vpack.c.bf16 %v1119_v53, %v1116_v49 }
 0x428   : > { %v1078_v54 = vpop.f32.mrf.mxu0  ;;  %v1974_v55 = vpop.f32.mrf.mxu1 }
 0x429   : > { %v1205_v56 = vpack.c.bf16 %v1078_v54, %v1075_v50 }
 0x42a   : > { %v1968_v58 = vpop.f32.mrf.mxu0  ;;  %v1198_v59 = vpop.f32.mrf.mxu1 }
 0x42b   : > { %1991 = vmatprep.mubr.msk.bf16.mxu0 %vm846_vm5, %v1205_v56 }
 0x42c   : > { %v1157_v60 = vpop.f32.mrf.mxu0  ;;  %v1985_v61 = vpop.f32.mrf.mxu1  ;;  %1992 = vmatmul.mubr.msk.bf16.vlgmr.msra.gmra.mxu0 %vm846_vm5, %v1206_v57 }
 0x42d   : > { %2012 = vmatpush3.bf16.msra.mxu0 %v1520_v10 }
 0x42e   : > { %v1979_v62 = vpop.f32.mrf.mxu0  ;;  %v1201_v63 = vpop.f32.mrf.mxu1  ;;  %2013 = vmatprep.subr.bf16.mxu0 %v2196_v0 }
 0x42f   : > { %v1208_v4 = vpack.c.bf16 %v1201_v63, %v1198_v59 }
 0x430   : > { %v1160_v1 = vpop.f32.mrf.mxu0  ;;  %v1986_v2 = vpop.f32.mrf.mxu1 }
 0x431   : > { %v1207_v3 = vpack.c.bf16 %v1160_v1, %v1157_v60  ;;  %2014 = vmatpush3.bf16.msra.mxu0 %v2100_v12 }
 0x432   : > { %v1980_v5 = vpop.f32.mrf.mxu0  ;;  %v2005_v14 = vpop.f32.mrf.mxu1 }
 0x433   : > { %1995 = vmatprep.mubr.msk.bf16.mxu0 %vm846_vm5, %v1207_v3 }
 0x434   : > { %1996 = vmatmul.mubr.msk.bf16.gmra.mxu0 %vm846_vm5, %v1208_v4  ;;  %v1356_v15 = vpop.f32.mrf.mxu1 }
 0x435   : > { %2015 = vmatprep.mubr.msk.bf16.mxu0 %vm2197_vm0, %v2196_v0 }
 0x436   : > { %v2006_v16 = vpop.f32.mrf.mxu1 }
 0x438   : > { %v1359_v17 = vpop.f32.mrf.mxu1 }
 0x43a   : > { %v2009_v26 = vpop.f32.mrf.mxu1 }
 0x43c   : > { %v1372_v32 = vpop.f32.mrf.mxu1 }
 0x43e   : > { %v2010_v45 = vpop.f32.mrf.mxu1 }
 0x440   : > { %v1375_v57 = vpop.f32.mrf.mxu1 }
 0x4ec   : > { %v1993_v19 = vpop.f32.mrf.mxu0 }
 0x4ed   : > { %v1365_v20 = vadd.f32 %v2005_v14, %v1993_v19 }
 0x4ee   : > { %v1267_v21 = vpop.f32.mrf.mxu0 }
 0x4ef   : > { %v1393_v22 = vadd.f32 %v1793_v18, %v1365_v20  ;;  %v1357_v23 = vadd.f32 %v1356_v15, %v1267_v21 }
 0x4f0   : > { %v1994_v27 = vpop.f32.mrf.mxu0 }
 0x4f1   : > { %v1391_v28 = vadd.f32 %v1793_v18, %v1357_v23  ;;  %v1368_v0 = vadd.f32 %v2006_v16, %v1994_v27  ;;  %v1401_v29 = vmax.f32 %v1393_v22, 0.0 }
 0x4f2   : > { %v1270_v30 = vpop.f32.mrf.mxu0 }
 0x4f3   : > { %v1394_v31 = vadd.f32 %v1793_v18, %v1368_v0  ;;  %v1360_v33 = vadd.f32 %v1359_v17, %v1270_v30  ;;  %v1399_v35 = vmax.f32 %v1391_v28, 0.0  ;;  %v1416_v38 = vsel %vm846_vm5, %v1401_v29, -inf }
 0x4f4   : > { %v1997_v34 = vpop.f32.mrf.mxu0  ;;  %v1452_v41 = vsel %vm846_vm5, %v1401_v29, 0.0 }
 0x4f5   : > { %v1402_v36 = vmax.f32 %v1394_v31, 0.0  ;;  %v1381_v37 = vadd.f32 %v2009_v26, %v1997_v34  ;;  %v1392_v39 = vadd.f32 %v1793_v18, %v1360_v33  ;;  %v1407_v25 = vsel %vm846_vm5, %v1399_v35, -inf }
 0x4f6   : > { %v1283_v40 = vpop.f32.mrf.mxu0  ;;  %v1443_v24 = vsel %vm846_vm5, %v1399_v35, 0.0 }
 0x4f7   : > { %v1417_v42 = vsel %vm846_vm5, %v1402_v36, -inf  ;;  %v1453_v43 = vsel %vm846_vm5, %v1402_v36, 0.0  ;;  %v1397_v44 = vadd.f32 %v1793_v18, %v1381_v37  ;;  %v1400_v13 = vmax.f32 %v1392_v39, 0.0 }
 0x4f8   : > { %v1418_v46 = vmax.f32 %v1416_v38, %v1417_v42  ;;  %v1454_v47 = vadd.f32 %v1453_v43, %v1452_v41  ;;  %v1373_v48 = vadd.f32 %v1372_v32, %v1283_v40  ;;  %v1998_v9 = vpop.f32.mrf.mxu0 }
 0x4f9   : > { %v1384_v49 = vadd.f32 %v2010_v45, %v1998_v9  ;;  %v1408_v52 = vsel %vm846_vm5, %v1400_v13, -inf  ;;  %v1444_v53 = vsel %vm846_vm5, %v1400_v13, 0.0  ;;  %v1405_v59 = vmax.f32 %v1397_v44, 0.0 }
 0x4fa   : > { %v1419_v50 = vrot.slane %v1418_v46, 4  ;;  %v1455_v51 = vrot.slane %v1454_v47, 4  ;;  %v1286_v54 = vpop.f32.mrf.mxu0  ;;  %v1409_v55 = vmax.f32 %v1407_v25, %v1408_v52  ;;  %v1445_v56 = vadd.f32 %v1444_v53, %v1443_v24 }
 0x4fb   : > { %v1395_v60 = vadd.f32 %v1793_v18, %v1373_v48  ;;  %v1398_v61 = vadd.f32 %v1793_v18, %v1384_v49  ;;  %v1376_v1 = vadd.f32 %v1375_v57, %v1286_v54  ;;  %v1434_v8 = vsel %vm846_vm5, %v1405_v59, -inf }
 0x4fc   : > { %v1456_v58 = vadd.f32 %v1455_v51, %v1454_v47  ;;  %v1410_v62 = vrot.slane %v1409_v55, 4  ;;  %v1446_v63 = vrot.slane %v1445_v56, 4  ;;  %v1420_v2 = vmax.f32 %v1418_v46, %v1419_v50 }
 0x4fd   : > { %v1406_v5 = vmax.f32 %v1398_v61, 0.0  ;;  %v1396_v6 = vadd.f32 %v1793_v18, %v1376_v1  ;;  %v1470_v10 = vsel %vm846_vm5, %v1405_v59, 0.0  ;;  %v1403_v11 = vmax.f32 %v1395_v60, 0.0 }
 0x4fe   : > { %v1411_v3 = vmax.f32 %v1409_v55, %v1410_v62  ;;  %v1447_v4 = vadd.f32 %v1446_v63, %v1445_v56  ;;  %v1457_v7 = vrot.slane %v1456_v58, 2  ;;  %v1421_v17 = vrot.slane %v1420_v2, 2 }
 0x4ff   : > { %v1435_v15 = vsel %vm846_vm5, %v1406_v5, -inf  ;;  %v1471_v16 = vsel %vm846_vm5, %v1406_v5, 0.0  ;;  %v1404_v22 = vmax.f32 %v1396_v6, 0.0  ;;  %v1425_v28 = vsel %vm846_vm5, %v1403_v11, -inf }
 0x500   : > { %v1412_v12 = vrot.slane %v1411_v3, 2  ;;  %v1448_v14 = vrot.slane %v1447_v4, 2  ;;  %v1436_v19 = vmax.f32 %v1434_v8, %v1435_v15  ;;  %v1472_v20 = vadd.f32 %v1471_v16, %v1470_v10 }
 0x501   : > { %v1458_v23 = vadd.f32 %v1457_v7, %v1456_v58  ;;  %v1461_v0 = vsel %vm846_vm5, %v1403_v11, 0.0  ;;  %v1426_v29 = vsel %vm846_vm5, %v1404_v22, -inf  ;;  %v1462_v30 = vsel %vm846_vm5, %v1404_v22, 0.0 }
 0x502   : > { %v1449_v21 = vadd.f32 %v1448_v14, %v1447_v4  ;;  %v1413_v26 = vmax.f32 %v1411_v3, %v1412_v12  ;;  %v1437_v18 = vrot.slane %v1436_v19, 4  ;;  %v1473_v27 = vrot.slane %v1472_v20, 4 }
 0x503   : > { %v1422_v31 = vmax.f32 %v1420_v2, %v1421_v17  ;;  %v1427_v35 = vmax.f32 %v1425_v28, %v1426_v29  ;;  %v1463_v36 = vadd.f32 %v1462_v30, %v1461_v0  ;;  %v1459_v37 = vrot.slane %v1458_v23, 1  ;;  %v1800_v29 = vld [vmem:[%s2500_s3 + $0x3] ss:$0 sm:$0xff] }
 0x504   : > { %v1450_v32 = vrot.slane %v1449_v21, 1  ;;  %v1438_v33 = vmax.f32 %v1436_v19, %v1437_v18  ;;  %v1474_v34 = vadd.f32 %v1473_v27, %v1472_v20  ;;  %v1414_v38 = vrot.slane %v1413_v26, 1 }
 0x505   : > { %v1428_v41 = vrot.slane %v1427_v35, 4  ;;  %v1464_v42 = vrot.slane %v1463_v36, 4  ;;  %v1423_v43 = vrot.slane %v1422_v31, 1  ;;  %v1460_v48 = vadd.f32 %v1459_v37, %v1458_v23 }
 0x506   : > { %v1439_v39 = vrot.slane %v1438_v33, 2  ;;  %v1475_v40 = vrot.slane %v1474_v34, 2  ;;  %v1451_v44 = vadd.f32 %v1450_v32, %v1449_v21  ;;  %v1415_v9 = vmax.f32 %v1413_v26, %v1414_v38 }
 0x507   : > { %v1429_v47 = vmax.f32 %v1427_v35, %v1428_v41  ;;  %v1465_v13 = vadd.f32 %v1464_v42, %v1463_v36  ;;  %v1424_v51 = vmax.f32 %v1422_v31, %v1423_v43  ;;  %v1481_v56 = vmul.f32 0.0625, %v1460_v48 }
 0x508   : > { %v1440_v45 = vmax.f32 %v1438_v33, %v1439_v39  ;;  %v1476_v46 = vadd.f32 %v1475_v40, %v1474_v34  ;;  %v1480_v52 = vmul.f32 0.0625, %v1451_v44  ;;  %v1484_v57 = vpack.c.bf16 %v1415_v9, %v1415_v9 }
 0x509   : > { %v1430_v49 = vrot.slane %v1429_v47, 2  ;;  %v1466_v50 = vrot.slane %v1465_v13, 2  ;;  %v1485_v61 = vpack.c.bf16 %v1424_v51, %v1424_v51  ;;  %v1489_v3 = vpack.c.bf16 %v1481_v56, %v1481_v56 }
 0x50a   : > { %v1441_v25 = vrot.slane %v1440_v45, 1  ;;  %v1477_v24 = vrot.slane %v1476_v46, 1  ;;  %v1488_v62 = vpack.c.bf16 %v1480_v52, %v1480_v52  ;;  %v1566_v4 = vunpack.c.l.b16 %v1484_v57 }
 0x50b   : > { %v1431_v54 = vmax.f32 %v1429_v47, %v1430_v49  ;;  %v1467_v55 = vadd.f32 %v1466_v50, %v1465_v13  ;;  %v1567_v8 = vunpack.c.l.b16 %v1485_v61  ;;  %v1497_v15 = vunpack.c.l.b16 %v1489_v3 }
 0x50c   : > { %v1478_v53 = vadd.f32 %v1477_v24, %v1476_v46  ;;  %v1442_v58 = vmax.f32 %v1440_v45, %v1441_v25  ;;  %v1496_v10 = vunpack.c.l.b16 %v1488_v62 }
 0x50d   : > { %v1432_v59 = vrot.slane %v1431_v54, 1  ;;  %v1468_v60 = vrot.slane %v1467_v55, 1  ;;  %v1570_v16 = vsel %vm1500_vm6, %v1567_v8, %v1566_v4 }
 0x50e   : > { %v1483_v63 = vmul.f32 0.0625, %v1478_v53  ;;  %v1487_v5 = vpack.c.bf16 %v1442_v58, %v1442_v58  ;;  %v1501_v21 = vsel %vm1500_vm6, %v1497_v15, %v1496_v10 }
 0x50f   : > { %v1433_v1 = vmax.f32 %v1431_v54, %v1432_v59  ;;  %v1469_v2 = vadd.f32 %v1468_v60, %v1467_v55 }
 0x510   : > { %v1491_v11 = vpack.c.bf16 %v1483_v63, %v1483_v63  ;;  %v1569_v17 = vunpack.c.l.b16 %v1487_v5 }
 0x511   : > { %v1482_v6 = vmul.f32 0.0625, %v1469_v2  ;;  %v1486_v7 = vpack.c.bf16 %v1433_v1, %v1433_v1 }
 0x512   : > { %v1499_v22 = vunpack.c.l.b16 %v1491_v11 }
 0x513   : > { %v1490_v12 = vpack.c.bf16 %v1482_v6, %v1482_v6  ;;  %v1568_v14 = vunpack.c.l.b16 %v1486_v7 }
 0x515   : > { %v1498_v19 = vunpack.c.l.b16 %v1490_v12  ;;  %v1571_v20 = vsel %vm1502_vm7, %v1568_v14, %v1570_v16 }
 0x516   : > { %v1572_v23 = vsel %vm1504_vm8, %v1569_v17, %v1571_v20 }
 0x517   : > { %v1503_v26 = vsel %vm1502_vm7, %v1498_v19, %v1501_v21  ;;  %v1573_v18 = vpack.c.b16 %v1572_v23, %v1572_v23 }
 0x518   : > { %v1505_v27 = vsel %vm1504_vm8, %v1499_v22, %v1503_v26 }
 0x519   : > { %2024 = vmatmul.mubr.msk.bf16.vlgmr.msra.gmra.mxu1 %vm846_vm5, %v1573_v18  ;;  %v1506_v28 = vpack.c.b16 %v1505_v27, %v1505_v27 }
 0x51b   : > { %2016 = vmatmul.mubr.msk.bf16.vlgmr.msra.gmra.mxu0 %vm846_vm5, %v1506_v28 }
 0x5d9   : > { %v1623_v0 = vpop.f32.mrf.mxu1 }
 0x5db   : > { %v1556_v30 = vpop.f32.mrf.mxu0  ;;  %v2025_v31 = vpop.f32.mrf.mxu1 }
 0x5dc   : > { %v1624_v32 = vadd.f32 %v1623_v0, %v1556_v30 }
 0x5dd   : > { %v2017_v33 = vpop.f32.mrf.mxu0  ;;  %v1626_v34 = vpop.f32.mrf.mxu1 }
 0x5de   : > { %v1633_v35 = vadd.f32 %v1800_v29, %v1624_v32 }
 0x5df   : > { %v1559_v36 = vpop.f32.mrf.mxu0  ;;  %v2026_v37 = vpop.f32.mrf.mxu1 }
 0x5e0   : > { %1634 = vst [vmem:[%s226_s11] sm:$0xf] %v1633_v35 }
 0x5e1   : > { %v2018_v38 = vpop.f32.mrf.mxu0 }
 0x5e2   : > { %2140 = shalt.err (!%p2137_p0)
}
 0x5e3   : > { %s2141_s29 = scalar_lea.hbm %s2456_s20, 64  ;;  %s2145_s6 = scalar_lea.hbm %s2501_s4, 128 }
 0x5e4   : > { %p2142_p1 = scmp.ne.s32.totalorder %s2456_s20, %s2141_s29  ;;  %p2146_p4 = scmp.lt.s32.totalorder %s2456_s20, %s2501_s4 }
 0x5e5   : > { %p2147_p7 = scmp.lt.s32.totalorder %s2145_s6, %s2141_s29 }
 0x5e6   : > { %p2143_p2 = pnand %p2142_p1, %p2262_p5 }
 0x5e7   : > { %p2148_p6 = por %p2147_p7, %p2146_p4 }
 0x5e8   : > { %p2144_p3 = pneg %p2143_p2 }
 0x5ea   : > { %p2149_p8 = pnand %p2148_p6, %p2144_p3 }
 0x5ec   : > { %2152 = shalt.err (!%p2149_p8)
}
 0x5ed   : > { %2037 = dma.vmem_to_hbm [thread:$0]  (%p2262_p5), %s2458_s12, 64, %s2456_s20, %s1636_s19  }
 0x5ee PF: > { %p2049_p9 = scmp.ge.s32.totalorder %s2191_s18, 2  ;;  %s1661_s9 = sand.u32 1, %s2179_s15  }
 0x5ef   : > { %p2505_p10 = scmp.ne.s32.totalorder %s2503_s26, 0  ;;  %s1662_s10 = scalar_lea.sflag [#allocation4], %s1661_s9 }
 0x5f1   : > { %p2044_p11 = pnand %p2049_p9, %p2505_p10 }
 0x5f3   : > { %p2045_p12 = pneg %p2044_p11 }
 0x5f5   : > { %2174 = dma.done.wait (%p2045_p12), %s1662_s10, 64  }
 0x5f6   : > { %2176 = vsyncadd (%p2045_p12), %s1662_s10, 4294967232  ;;  %p15_p13 = scmp.ge.s32.totalorder %s2249_s21, 4   ;;  %s2506_s15 = smov %s2183_s16 }
 0x5f7   : > { %s2507_s16 = smov %s2187_s17  ;;  %s2508_s17 = smov %s2260_s24 }
 0x5f8   : > { %s2509_s18 = smov %s2249_s21  ;;  %17 = sbr.rel (!%p15_p13) target bundleno = 4 (0x4), region = 79 }
 0x5fd   :  { %1667 = vsyncpa [#allocation3], 1 }
 0x5fe   :  { %1669 = vsyncpa [#allocation3 + $0x1], 1 }
 0x5ff   :  { %1670 = vsyncpa [#allocation4], 1 }
 0x600   :  { %1672 = vsyncpa [#allocation4 + $0x1], 1 }

</bundles_post_ra>
